<compile_context>
chip_gen: v6e
topology: v6e:2x2x1
jax: 0.10.0
libtpu: 0.0.40
codegen_flags: <defaults>
</compile_context>

<pallas_src>
import functools

import jax
import jax.numpy as jnp
from jax import lax
from jax.experimental import pallas as pl
from jax.experimental.pallas import tpu as pltpu

LANE = 128
SUBLANE = 8
NEG_INF = -1e30


# ------------------------------- utilities --------------------------------- #

def _round_up(x, m):
    return ((x + m - 1) // m) * m


def _pick_tile(dim, cap, step):
    """Largest tile <= cap that divides dim (dim is a multiple of `step`)."""
    if dim <= cap:
        return dim
    t = (cap // step) * step
    while dim % t != 0:
        t -= step
    return t


def _vmem_limit_bytes(estimate):
    # Never claim the entire physical VMEM (v7x has only 64 MiB per TC) and
    # never go below the 32 MiB scoped default.
    return int(min(max(2 * int(estimate), 32 * 1024 * 1024), 48 * 1024 * 1024))


def _full_spec(shape):
    zeros = (0,) * len(shape)
    return pl.BlockSpec(shape, lambda i, _z=zeros: _z)


def _masked_log_softmax(logits, valid_cols):
    rows, cols = logits.shape
    if valid_cols is not None and valid_cols < cols:
        col = lax.broadcasted_iota(jnp.int32, (rows, cols), 1)
        logits = jnp.where(col < valid_cols, logits, NEG_INF)
    m = jnp.max(logits, axis=1, keepdims=True)
    shifted = logits - m
    lse = jnp.log(jnp.sum(jnp.exp(shifted), axis=1, keepdims=True))
    return shifted - lse


# ------------------- fused single-call path (small graphs) ----------------- #

def _make_fused_kernel(num_layers, valid_cols):
    def kernel(a_ref, x_ref, p_ref, *rest):
        out_ref = rest[-1]
        prefs = rest[:-1]
        a = a_ref[...]                                    # (n_pad, n_pad) bf16
        h = x_ref[...]                                    # (n_pad, f_pad) bf16
        for l in range(num_layers):
            w = prefs[2 * l][...]                         # (fi_pad, fo_pad) bf16
            b = prefs[2 * l + 1][...]                     # (1, fo_pad) f32
            hw = jnp.dot(h, w, preferred_element_type=jnp.float32)
            ah = jnp.dot(a, hw.astype(jnp.bfloat16),
                         preferred_element_type=jnp.float32)
            h = jnp.maximum(ah + b, 0.0).astype(jnp.bfloat16)
        pooled = jnp.dot(p_ref[...], h, preferred_element_type=jnp.float32)
        w_fc = prefs[2 * num_layers][...]
        b_fc = prefs[2 * num_layers + 1][...]
        logits = jnp.dot(pooled.astype(jnp.bfloat16), w_fc,
                         preferred_element_type=jnp.float32) + b_fc
        out_ref[...] = _masked_log_softmax(logits, valid_cols).astype(out_ref.dtype)

    return kernel


def gcn_forward_fused(a_hat, x_pad, pool, conv_padded, fc_padded, out_ch):
    n_pad = a_hat.shape[0]
    g_pad = pool.shape[0]
    w_fc_p, b_fc_p = fc_padded
    out_pad = w_fc_p.shape[1]
    num_layers = len(conv_padded)

    inputs = [a_hat, x_pad, pool]
    for w_p, b_p in conv_padded:
        inputs += [w_p, b_p]
    inputs += [w_fc_p, b_fc_p]

    in_bytes = sum(int(arr.size) * arr.dtype.itemsize for arr in inputs)
    out_bytes = g_pad * out_pad * 4
    max_feat = max([x_pad.shape[1]] + [w.shape[1] for w, _ in conv_padded])
    scratch_bytes = 4 * n_pad * max_feat * 4          # in-kernel f32 intermediates

    flops = 0
    f_prev = x_pad.shape[1]
    for w_p, _ in conv_padded:
        fo = w_p.shape[1]
        flops += 2 * n_pad * f_prev * fo + 2 * n_pad * n_pad * fo
        f_prev = fo
    flops += 2 * g_pad * n_pad * f_prev + 2 * g_pad * f_prev * out_pad

    return pl.pallas_call(
        _make_fused_kernel(num_layers, out_ch),
        out_shape=jax.ShapeDtypeStruct((g_pad, out_pad), jnp.float32),
        grid=(1,),
        in_specs=[_full_spec(arr.shape) for arr in inputs],
        out_specs=_full_spec((g_pad, out_pad)),
        compiler_params=pltpu.CompilerParams(
            dimension_semantics=("arbitrary",),
            vmem_limit_bytes=_vmem_limit_bytes(
                2 * (in_bytes + out_bytes) + scratch_bytes),
        ),
        cost_estimate=pl.CostEstimate(
            flops=int(flops),
            transcendentals=int(g_pad * out_pad),
            bytes_accessed=int(in_bytes + out_bytes),
        ),
    )(*inputs)


# ------------------ tiled fallback path (larger graphs) -------------------- #

def _gcn_layer_kernel(a_ref, h_ref, w_ref, b_ref, o_ref, acc_ref, *, tk):
    """Per row-tile: out = relu((A @ H) @ W + b); reduction over grid axis 1."""
    k = pl.program_id(1)

    @pl.when(k == 0)
    def _():
        acc_ref[...] = jnp.zeros_like(acc_ref)

    start = pl.multiple_of(k * tk, tk)
    acc_ref[...] += jnp.dot(a_ref[...], h_ref[pl.ds(start, tk), :],
                            preferred_element_type=jnp.float32)

    @pl.when(k == pl.num_programs(1) - 1)
    def _():
        out = jnp.dot(acc_ref[...].astype(jnp.bfloat16), w_ref[...],
                      preferred_element_type=jnp.float32)
        out = out + b_ref[...]
        o_ref[...] = jnp.maximum(out, 0.0).astype(o_ref.dtype)


def gcn_layer_tiled(a_hat, h, w_p, b_p, *, tm_cap=512, tk_cap=1024):
    n_pad = a_hat.shape[0]
    f_pad = h.shape[1]
    fo_pad = w_p.shape[1]

    tm = _pick_tile(n_pad, tm_cap, SUBLANE)
    if n_pad // tm < 2 and n_pad >= 256:   # give both v7x TensorCores work
        tm = n_pad // 2
    tk = _pick_tile(n_pad, tk_cap, LANE)
    grid = (n_pad // tm, n_pad // tk)

    resident = n_pad * f_pad * 2 + f_pad * fo_pad * 2 + fo_pad * 4
    tiles = 2 * tm * tk * 2 + 2 * tm * fo_pad * 2 + tm * f_pad * 4
    vmem = _vmem_limit_bytes(2 * resident + tiles)

    flops = 2 * n_pad * n_pad * f_pad + 2 * n_pad * f_pad * fo_pad
    bytes_accessed = (a_hat.size * 2 + h.size * 2 + w_p.size * 2
                      + b_p.size * 4 + n_pad * fo_pad * 2)

    return pl.pallas_call(
        functools.partial(_gcn_layer_kernel, tk=tk),
        out_shape=jax.ShapeDtypeStruct((n_pad, fo_pad), jnp.bfloat16),
        grid=grid,
        in_specs=[
            pl.BlockSpec((tm, tk), lambda i, k: (i, k)),          # A_hat tiled
            pl.BlockSpec((n_pad, f_pad), lambda i, k: (0, 0)),    # H resident
            pl.BlockSpec((f_pad, fo_pad), lambda i, k: (0, 0)),   # W resident
            pl.BlockSpec((1, fo_pad), lambda i, k: (0, 0)),       # b resident
        ],
        out_specs=pl.BlockSpec((tm, fo_pad), lambda i, k: (i, 0)),
        scratch_shapes=[pltpu.VMEM((tm, f_pad), jnp.float32)],
        compiler_params=pltpu.CompilerParams(
            dimension_semantics=("parallel", "arbitrary"),
            vmem_limit_bytes=vmem,
        ),
        cost_estimate=pl.CostEstimate(
            flops=int(flops), transcendentals=0,
            bytes_accessed=int(bytes_accessed)),
    )(a_hat, h, w_p, b_p)


def _pool_fc_kernel(p_ref, h_ref, wfc_ref, bfc_ref, o_ref, acc_ref, *,
                    tk, valid_cols):
    """out = log_softmax((P @ H) @ W_fc + b_fc); reduction over grid axis 1."""
    k = pl.program_id(1)

    @pl.when(k == 0)
    def _():
        acc_ref[...] = jnp.zeros_like(acc_ref)

    start = pl.multiple_of(k * tk, tk)
    acc_ref[...] += jnp.dot(p_ref[...], h_ref[pl.ds(start, tk), :],
                            preferred_element_type=jnp.float32)

    @pl.when(k == pl.num_programs(1) - 1)
    def _():
        logits = jnp.dot(acc_ref[...].astype(jnp.bfloat16), wfc_ref[...],
                         preferred_element_type=jnp.float32) + bfc_ref[...]
        o_ref[...] = _masked_log_softmax(logits, valid_cols).astype(o_ref.dtype)


def pool_fc_tiled(pool, h, w_fc_p, b_fc_p, out_ch, *, tg_cap=256, tk_cap=1024):
    g_pad, n_pad = pool.shape
    hid_pad = h.shape[1]
    out_pad = w_fc_p.shape[1]

    tg = _pick_tile(g_pad, tg_cap, SUBLANE)
    tk = _pick_tile(n_pad, tk_cap, LANE)
    grid = (g_pad // tg, n_pad // tk)

    resident = n_pad * hid_pad * 2 + hid_pad * out_pad * 2 + out_pad * 4
    tiles = 2 * tg * tk * 2 + 2 * tg * out_pad * 4 + tg * hid_pad * 4
    vmem = _vmem_limit_bytes(2 * resident + tiles)

    flops = 2 * g_pad * n_pad * hid_pad + 2 * g_pad * hid_pad * out_pad
    bytes_accessed = (pool.size * 2 + h.size * 2 + w_fc_p.size * 2
                      + b_fc_p.size * 4 + g_pad * out_pad * 4)

    return pl.pallas_call(
        functools.partial(_pool_fc_kernel, tk=tk, valid_cols=out_ch),
        out_shape=jax.ShapeDtypeStruct((g_pad, out_pad), jnp.float32),
        grid=grid,
        in_specs=[
            pl.BlockSpec((tg, tk), lambda i, k: (i, k)),            # P tiled
            pl.BlockSpec((n_pad, hid_pad), lambda i, k: (0, 0)),    # H resident
            pl.BlockSpec((hid_pad, out_pad), lambda i, k: (0, 0)),  # W_fc resident
            pl.BlockSpec((1, out_pad), lambda i, k: (0, 0)),        # b_fc resident
        ],
        out_specs=pl.BlockSpec((tg, out_pad), lambda i, k: (i, 0)),
        scratch_shapes=[pltpu.VMEM((tg, hid_pad), jnp.float32)],
        compiler_params=pltpu.CompilerParams(
            dimension_semantics=("parallel", "arbitrary"),
            vmem_limit_bytes=vmem,
        ),
        cost_estimate=pl.CostEstimate(
            flops=int(flops),
            transcendentals=int(g_pad * out_pad),
            bytes_accessed=int(bytes_accessed)),
    )(pool, h, w_fc_p, b_fc_p)


# ------------------------------- glue (JAX) -------------------------------- #

def _pad2d(x, rows, cols, dtype):
    out = jnp.zeros((rows, cols), dtype=dtype)
    return out.at[: x.shape[0], : x.shape[1]].set(x.astype(dtype))


def build_normalized_adjacency(edge_index, num_nodes, n_pad, dtype=jnp.bfloat16):
    """Dense symmetric-normalized adjacency (add_self_loops=False), zero-padded.

    A_hat[dst, src] = deg(dst)^-1/2 * deg(src)^-1/2 (PyG gcn_norm, deg on targets).
    """
    row, col = edge_index[0], edge_index[1]
    ones = jnp.ones(row.shape[0], dtype=jnp.float32)
    deg = jnp.zeros((num_nodes,), dtype=jnp.float32).at[col].add(ones)
    deg_inv_sqrt = jnp.where(deg > 0, 1.0 / jnp.sqrt(deg), 0.0)
    norm = deg_inv_sqrt[row] * deg_inv_sqrt[col]
    a_hat = jnp.zeros((n_pad, n_pad), dtype=jnp.float32)
    a_hat = a_hat.at[col, row].add(norm)
    # TODO(synk): block-sparse A_hat (PrefetchScalarGridSpec) + fp8/int8 storage
    # for large sparse graphs.
    return a_hat.astype(dtype)


def build_pooling_matrix(batch, num_nodes, g_pad, n_pad, dtype=jnp.bfloat16):
    p = jnp.zeros((g_pad, n_pad), dtype=jnp.float32)
    p = p.at[batch, jnp.arange(num_nodes)].add(1.0)
    return p.astype(dtype)


def glorot_uniform(key, fan_in, fan_out):
    limit = jnp.sqrt(6.0 / (fan_in + fan_out))
    return jax.random.uniform(key, (fan_in, fan_out), jnp.float32,
                              minval=-limit, maxval=limit)


def init_params(key, in_channels, hidden_channels, out_channels, num_layers):
    dims = []
    if num_layers > 1:
        dims.append((in_channels, hidden_channels))
        for _ in range(num_layers - 2):
            dims.append((hidden_channels, hidden_channels))
        dims.append((hidden_channels, hidden_channels))
    else:
        dims.append((in_channels, hidden_channels))

    conv_params = []
    for fi, fo in dims:
        key, wk = jax.random.split(key)
        conv_params.append((glorot_uniform(wk, fi, fo),
                            jnp.zeros((fo,), jnp.float32)))

    key, wk, bk = jax.random.split(key, 3)
    bound = 1.0 / float(jnp.sqrt(float(hidden_channels)))
    w_fc = jax.random.uniform(wk, (hidden_channels, out_channels), jnp.float32,
                              minval=-bound, maxval=bound)
    b_fc = jax.random.uniform(bk, (out_channels,), jnp.float32,
                              minval=-bound, maxval=bound)
    return conv_params, (w_fc, b_fc)


def gcn_graph_classifier_forward(x, edge_index, batch, conv_params, fc_params,
                                 num_graphs, out_channels, force_tiled=False):
    num_nodes, f_in = x.shape
    n_pad = _round_up(max(num_nodes, SUBLANE), LANE)
    if n_pad > 256:
        n_pad = _round_up(n_pad, 256)   # keep tiles from collapsing to 128
    g_pad = _round_up(max(num_graphs, 1), SUBLANE)

    a_hat = build_normalized_adjacency(edge_index, num_nodes, n_pad)
    pool = build_pooling_matrix(batch, num_nodes, g_pad, n_pad)

    f_in_pad = _round_up(f_in, LANE)
    x_pad = _pad2d(x, n_pad, f_in_pad, jnp.bfloat16)

    conv_padded = []
    for (w, b) in conv_params:
        fi, fo = w.shape
        fo_pad = _round_up(fo, LANE)
        w_p = _pad2d(w, _round_up(fi, LANE), fo_pad, jnp.bfloat16)
        b_p = jnp.zeros((1, fo_pad), jnp.float32).at[0, :fo].set(b)
        conv_padded.append((w_p, b_p))

    w_fc, b_fc = fc_params
    hid, out_ch = w_fc.shape
    out_pad = _round_up(out_ch, LANE)
    w_fc_p = _pad2d(w_fc, _round_up(hid, LANE), out_pad, jnp.bfloat16)
    b_fc_p = jnp.zeros((1, out_pad), jnp.float32).at[0, :out_ch].set(b_fc)
    fc_padded = (w_fc_p, b_fc_p)

    # Choose the fully fused single-call path when everything (with
    # double-buffering headroom) fits comfortably in VMEM on any generation.
    static_bytes = (a_hat.size * 2 + x_pad.size * 2 + pool.size * 2
                    + sum(w.size * 2 + b.size * 4 for w, b in conv_padded)
                    + w_fc_p.size * 2 + b_fc_p.size * 4 + g_pad * out_pad * 4)
    max_feat = max([f_in_pad] + [w.shape[1] for w, _ in conv_padded])
    fused_need = 2 * int(static_bytes) + 4 * n_pad * max_feat * 4

    if not force_tiled and fused_need <= 40 * 1024 * 1024:
        logits = gcn_forward_fused(a_hat, x_pad, pool, conv_padded,
                                   fc_padded, out_ch)
    else:
        h = x_pad
        for (w_p, b_p) in conv_padded:
            h = gcn_layer_tiled(a_hat, h, w_p, b_p)
        logits = pool_fc_tiled(pool, h, w_fc_p, b_fc_p, out_ch)

    return logits[:num_graphs, :out_channels]


def reference_forward(x, edge_index, batch, conv_params, fc_params, num_graphs):
    """Pure-JAX f32 reference mirroring GCNGraphClassifier semantics."""
    row, col = edge_index[0], edge_index[1]
    n = x.shape[0]
    deg = jnp.zeros((n,), jnp.float32).at[col].add(1.0)
    dis = jnp.where(deg > 0, 1.0 / jnp.sqrt(deg), 0.0)
    norm = dis[row] * dis[col]
    a = jnp.zeros((n, n), jnp.float32).at[col, row].add(norm)
    h = x.astype(jnp.float32)
    for (w, b) in conv_params:
        h = jnp.maximum(a @ (h @ w) + b, 0.0)
    pooled = jnp.zeros((num_graphs, h.shape[1]), jnp.float32).at[batch].add(h)
    w_fc, b_fc = fc_params
    return jax.nn.log_softmax(pooled @ w_fc + b_fc, axis=1)


# --------------------------------- main ------------------------------------ #

if __name__ == "__main__":
    key = jax.random.PRNGKey(0)

    in_channels = 8
    hidden_channels = 64
    out_channels = 4
    num_layers = 2

    # ---- Demo 1: tiny two-graph batch -> single fused pallas_call ----
    num_nodes = 16
    num_graphs = 2
    keys = jax.random.split(key, 6)
    x = jax.random.normal(keys[0], (num_nodes, in_channels), dtype=jnp.float32)
    src0 = jax.random.randint(keys[1], (24,), 0, 8, dtype=jnp.int32)
    dst0 = jax.random.randint(keys[2], (24,), 0, 8, dtype=jnp.int32)
    src1 = jax.random.randint(keys[3], (24,), 8, 16, dtype=jnp.int32)
    dst1 = jax.random.randint(keys[4], (24,), 8, 16, dtype=jnp.int32)
    edge_index = jnp.stack([jnp.concatenate([src0, src1]),
                            jnp.concatenate([dst0, dst1])], axis=0)
    batch = jnp.concatenate([jnp.zeros((8,), jnp.int32),
                             jnp.ones((8,), jnp.int32)])

    conv_params, fc_params = init_params(keys[5], in_channels, hidden_channels,
                                         out_channels, num_layers)

    out = gcn_graph_classifier_forward(x, edge_index, batch, conv_params,
                                       fc_params, num_graphs, out_channels)
    out = jax.block_until_ready(out)
    ref = reference_forward(x, edge_index, batch, conv_params, fc_params,
                            num_graphs)
    assert out.shape == (num_graphs, out_channels)
    assert jnp.allclose(jnp.sum(jnp.exp(out), axis=1), 1.0, atol=1e-3)
    assert float(jnp.max(jnp.abs(out - ref))) < 0.1

    # ---- Demo 2: larger batch -> tiled (per-layer fused-epilogue) path ----
    num_graphs2 = 3
    nodes_per = 64
    num_nodes2 = num_graphs2 * nodes_per
    srcs, dsts = [], []
    k2 = keys[5]
    for g in range(num_graphs2):
        k2, ka, kb = jax.random.split(k2, 3)
        srcs.append(jax.random.randint(ka, (128,), g * nodes_per,
                                       (g + 1) * nodes_per, dtype=jnp.int32))
        dsts.append(jax.random.randint(kb, (128,), g * nodes_per,
                                       (g + 1) * nodes_per, dtype=jnp.int32))
    edge_index2 = jnp.stack([jnp.concatenate(srcs), jnp.concatenate(dsts)],
                            axis=0)
    batch2 = jnp.repeat(jnp.arange(num_graphs2, dtype=jnp.int32), nodes_per)
    k2, kx = jax.random.split(k2)
    x2 = jax.random.normal(kx, (num_nodes2, in_channels), dtype=jnp.float32)

    out2 = gcn_graph_classifier_forward(x2, edge_index2, batch2, conv_params,
                                        fc_params, num_graphs2, out_channels,
                                        force_tiled=True)
    out2 = jax.block_until_ready(out2)
    ref2 = reference_forward(x2, edge_index2, batch2, conv_params, fc_params,
                             num_graphs2)
    assert out2.shape == (num_graphs2, out_channels)
    assert jnp.allclose(jnp.sum(jnp.exp(out2), axis=1), 1.0, atol=1e-3)
    assert float(jnp.max(jnp.abs(out2 - ref2))) < 0.5

    print("KERNEL_OK")
</pallas_src>

<mosaic_0001>
module attributes {stable_mosaic.version = 11 : i64} {
  func.func @kernel(%arg0: i32, %arg1: memref<128x128xbf16, #tpu.memory_space<vmem>>, %arg2: memref<128x128xbf16, #tpu.memory_space<vmem>>, %arg3: memref<8x128xbf16, #tpu.memory_space<vmem>>, %arg4: memref<128x128xbf16, #tpu.memory_space<vmem>>, %arg5: memref<1x128xf32, #tpu.memory_space<vmem>>, %arg6: memref<128x128xbf16, #tpu.memory_space<vmem>>, %arg7: memref<1x128xf32, #tpu.memory_space<vmem>>, %arg8: memref<128x128xbf16, #tpu.memory_space<vmem>>, %arg9: memref<1x128xf32, #tpu.memory_space<vmem>>, %arg10: memref<8x128xf32, #tpu.memory_space<vmem>>) attributes {dimension_semantics = [#tpu.dimension_semantics<arbitrary>], iteration_bounds = array<i64: 1>, scalar_prefetch = 0 : i64, scratch_operands = 0 : i64, tpu.core_type = #tpu.core_type<tc>, window_params = [{pipeline_mode = #tpu.pipeline_mode<synchronous>, transform_indices = @transform_0, window_bounds = array<i64: 128, 128>}, {pipeline_mode = #tpu.pipeline_mode<synchronous>, transform_indices = @transform_1, window_bounds = array<i64: 128, 128>}, {pipeline_mode = #tpu.pipeline_mode<synchronous>, transform_indices = @transform_2, window_bounds = array<i64: 8, 128>}, {pipeline_mode = #tpu.pipeline_mode<synchronous>, transform_indices = @transform_3, window_bounds = array<i64: 128, 128>}, {pipeline_mode = #tpu.pipeline_mode<synchronous>, transform_indices = @transform_4, window_bounds = array<i64: 1, 128>}, {pipeline_mode = #tpu.pipeline_mode<synchronous>, transform_indices = @transform_5, window_bounds = array<i64: 128, 128>}, {pipeline_mode = #tpu.pipeline_mode<synchronous>, transform_indices = @transform_6, window_bounds = array<i64: 1, 128>}, {pipeline_mode = #tpu.pipeline_mode<synchronous>, transform_indices = @transform_7, window_bounds = array<i64: 128, 128>}, {pipeline_mode = #tpu.pipeline_mode<synchronous>, transform_indices = @transform_8, window_bounds = array<i64: 1, 128>}, {pipeline_mode = #tpu.pipeline_mode<synchronous>, transform_indices = @transform_9, window_bounds = array<i64: 8, 128>}]} {
    %c0 = arith.constant 0 : index
    %c0_0 = arith.constant 0 : index
    %0 = vector.load %arg1[%c0, %c0_0] : memref<128x128xbf16, #tpu.memory_space<vmem>>, vector<128x128xbf16>
    %c0_1 = arith.constant 0 : index
    %c0_2 = arith.constant 0 : index
    %1 = vector.load %arg2[%c0_1, %c0_2] : memref<128x128xbf16, #tpu.memory_space<vmem>>, vector<128x128xbf16>
    %c0_3 = arith.constant 0 : index
    %c0_4 = arith.constant 0 : index
    %2 = vector.load %arg4[%c0_3, %c0_4] : memref<128x128xbf16, #tpu.memory_space<vmem>>, vector<128x128xbf16>
    %c0_5 = arith.constant 0 : index
    %c0_6 = arith.constant 0 : index
    %3 = vector.load %arg5[%c0_5, %c0_6] : memref<1x128xf32, #tpu.memory_space<vmem>>, vector<1x128xf32>
    %cst = arith.constant dense<0.000000e+00> : vector<128x128xf32>
    %4 = tpu.matmul %1, %2, %cst {dimension_numbers = #tpu.dot_dimension_numbers<[1], [0], [0], [1], [0, 0, 1, 1], [], []>} : vector<128x128xbf16>, vector<128x128xbf16>, vector<128x128xf32> -> vector<128x128xf32>
    %5 = arith.truncf %4 : vector<128x128xf32> to vector<128x128xbf16>
    %cst_7 = arith.constant dense<0.000000e+00> : vector<128x128xf32>
    %6 = tpu.matmul %0, %5, %cst_7 {dimension_numbers = #tpu.dot_dimension_numbers<[1], [0], [0], [1], [0, 0, 1, 1], [], []>} : vector<128x128xbf16>, vector<128x128xbf16>, vector<128x128xf32> -> vector<128x128xf32>
    %7 = vector.broadcast %3 : vector<1x128xf32> to vector<128x128xf32>
    %8 = arith.addf %6, %7 : vector<128x128xf32>
    %cst_8 = arith.constant 0.000000e+00 : f32
    %9 = vector.broadcast %cst_8 : f32 to vector<128x128xf32>
    %10 = arith.maximumf %8, %9 : vector<128x128xf32>
    %11 = arith.truncf %10 : vector<128x128xf32> to vector<128x128xbf16>
    %c0_9 = arith.constant 0 : index
    %c0_10 = arith.constant 0 : index
    %12 = vector.load %arg6[%c0_9, %c0_10] : memref<128x128xbf16, #tpu.memory_space<vmem>>, vector<128x128xbf16>
    %c0_11 = arith.constant 0 : index
    %c0_12 = arith.constant 0 : index
    %13 = vector.load %arg7[%c0_11, %c0_12] : memref<1x128xf32, #tpu.memory_space<vmem>>, vector<1x128xf32>
    %cst_13 = arith.constant dense<0.000000e+00> : vector<128x128xf32>
    %14 = tpu.matmul %11, %12, %cst_13 {dimension_numbers = #tpu.dot_dimension_numbers<[1], [0], [0], [1], [0, 0, 1, 1], [], []>} : vector<128x128xbf16>, vector<128x128xbf16>, vector<128x128xf32> -> vector<128x128xf32>
    %15 = arith.truncf %14 : vector<128x128xf32> to vector<128x128xbf16>
    %cst_14 = arith.constant dense<0.000000e+00> : vector<128x128xf32>
    %16 = tpu.matmul %0, %15, %cst_14 {dimension_numbers = #tpu.dot_dimension_numbers<[1], [0], [0], [1], [0, 0, 1, 1], [], []>} : vector<128x128xbf16>, vector<128x128xbf16>, vector<128x128xf32> -> vector<128x128xf32>
    %17 = vector.broadcast %13 : vector<1x128xf32> to vector<128x128xf32>
    %18 = arith.addf %16, %17 : vector<128x128xf32>
    %cst_15 = arith.constant 0.000000e+00 : f32
    %19 = vector.broadcast %cst_15 : f32 to vector<128x128xf32>
    %20 = arith.maximumf %18, %19 : vector<128x128xf32>
    %21 = arith.truncf %20 : vector<128x128xf32> to vector<128x128xbf16>
    %c0_16 = arith.constant 0 : index
    %c0_17 = arith.constant 0 : index
    %22 = vector.load %arg3[%c0_16, %c0_17] : memref<8x128xbf16, #tpu.memory_space<vmem>>, vector<8x128xbf16>
    %cst_18 = arith.constant dense<0.000000e+00> : vector<8x128xf32>
    %23 = tpu.matmul %22, %21, %cst_18 {dimension_numbers = #tpu.dot_dimension_numbers<[1], [0], [0], [1], [0, 0, 1, 1], [], []>} : vector<8x128xbf16>, vector<128x128xbf16>, vector<8x128xf32> -> vector<8x128xf32>
    %c0_19 = arith.constant 0 : index
    %c0_20 = arith.constant 0 : index
    %24 = vector.load %arg8[%c0_19, %c0_20] : memref<128x128xbf16, #tpu.memory_space<vmem>>, vector<128x128xbf16>
    %c0_21 = arith.constant 0 : index
    %c0_22 = arith.constant 0 : index
    %25 = vector.load %arg9[%c0_21, %c0_22] : memref<1x128xf32, #tpu.memory_space<vmem>>, vector<1x128xf32>
    %26 = arith.truncf %23 : vector<8x128xf32> to vector<8x128xbf16>
    %cst_23 = arith.constant dense<0.000000e+00> : vector<8x128xf32>
    %27 = tpu.matmul %26, %24, %cst_23 {dimension_numbers = #tpu.dot_dimension_numbers<[1], [0], [0], [1], [0, 0, 1, 1], [], []>} : vector<8x128xbf16>, vector<128x128xbf16>, vector<8x128xf32> -> vector<8x128xf32>
    %28 = vector.broadcast %25 : vector<1x128xf32> to vector<8x128xf32>
    %29 = arith.addf %27, %28 : vector<8x128xf32>
    %30 = tpu.iota {dimensions = array<i32: 1>} : vector<8x128xi32>
    %c4_i32 = arith.constant 4 : i32
    %31 = vector.broadcast %c4_i32 : i32 to vector<8x128xi32>
    %32 = arith.cmpi slt, %30, %31 : vector<8x128xi32>
    %cst_24 = arith.constant -1.000000e+30 : f32
    %33 = vector.broadcast %cst_24 : f32 to vector<8x128xf32>
    %34 = arith.select %32, %29, %33 : vector<8x128xi1>, vector<8x128xf32>
    %cst_25 = arith.constant dense<0xFF800000> : vector<8xf32>
    %35 = vector.multi_reduction <maximumf>, %34, %cst_25 [1] : vector<8x128xf32> to vector<8xf32>
    %36 = vector.shape_cast %35 : vector<8xf32> to vector<8x1xf32>
    %37 = vector.broadcast %36 : vector<8x1xf32> to vector<8x128xf32>
    %38 = arith.subf %34, %37 : vector<8x128xf32>
    %39 = math.exp %38 : vector<8x128xf32>
    %cst_26 = arith.constant dense<0.000000e+00> : vector<8xf32>
    %40 = vector.multi_reduction <add>, %39, %cst_26 [1] : vector<8x128xf32> to vector<8xf32>
    %41 = vector.shape_cast %40 : vector<8xf32> to vector<8x1xf32>
    %42 = math.log %41 : vector<8x1xf32>
    %43 = vector.broadcast %42 : vector<8x1xf32> to vector<8x128xf32>
    %44 = arith.subf %38, %43 : vector<8x128xf32>
    %c0_27 = arith.constant 0 : index
    %c0_28 = arith.constant 0 : index
    %45 = vector.load %arg10[%c0_27, %c0_28] : memref<8x128xf32, #tpu.memory_space<vmem>>, vector<8x128xf32>
    tpu.vector_store %arg10[%c0_27, %c0_28], %44 {strides = array<i32>} : memref<8x128xf32, #tpu.memory_space<vmem>>, vector<8x128xf32>,
    return
  }
  func.func @transform_0(%arg0: i32) -> (i32, i32) {
    %c0_i32 = arith.constant 0 : i32
    %c0_i32_0 = arith.constant 0 : i32
    %c0_i32_1 = arith.constant 0 : i32
    return %c0_i32, %c0_i32_0 : i32, i32
  }
  func.func @transform_1(%arg0: i32) -> (i32, i32) {
    %c0_i32 = arith.constant 0 : i32
    %c0_i32_0 = arith.constant 0 : i32
    %c0_i32_1 = arith.constant 0 : i32
    return %c0_i32, %c0_i32_0 : i32, i32
  }
  func.func @transform_2(%arg0: i32) -> (i32, i32) {
    %c0_i32 = arith.constant 0 : i32
    %c0_i32_0 = arith.constant 0 : i32
    %c0_i32_1 = arith.constant 0 : i32
    return %c0_i32, %c0_i32_0 : i32, i32
  }
  func.func @transform_3(%arg0: i32) -> (i32, i32) {
    %c0_i32 = arith.constant 0 : i32
    %c0_i32_0 = arith.constant 0 : i32
    %c0_i32_1 = arith.constant 0 : i32
    return %c0_i32, %c0_i32_0 : i32, i32
  }
  func.func @transform_4(%arg0: i32) -> (i32, i32) {
    %c0_i32 = arith.constant 0 : i32
    %c0_i32_0 = arith.constant 0 : i32
    %c0_i32_1 = arith.constant 0 : i32
    return %c0_i32, %c0_i32_0 : i32, i32
  }
  func.func @transform_5(%arg0: i32) -> (i32, i32) {
    %c0_i32 = arith.constant 0 : i32
    %c0_i32_0 = arith.constant 0 : i32
    %c0_i32_1 = arith.constant 0 : i32
    return %c0_i32, %c0_i32_0 : i32, i32
  }
  func.func @transform_6(%arg0: i32) -> (i32, i32) {
    %c0_i32 = arith.constant 0 : i32
    %c0_i32_0 = arith.constant 0 : i32
    %c0_i32_1 = arith.constant 0 : i32
    return %c0_i32, %c0_i32_0 : i32, i32
  }
  func.func @transform_7(%arg0: i32) -> (i32, i32) {
    %c0_i32 = arith.constant 0 : i32
    %c0_i32_0 = arith.constant 0 : i32
    %c0_i32_1 = arith.constant 0 : i32
    return %c0_i32, %c0_i32_0 : i32, i32
  }
  func.func @transform_8(%arg0: i32) -> (i32, i32) {
    %c0_i32 = arith.constant 0 : i32
    %c0_i32_0 = arith.constant 0 : i32
    %c0_i32_1 = arith.constant 0 : i32
    return %c0_i32, %c0_i32_0 : i32, i32
  }
  func.func @transform_9(%arg0: i32) -> (i32, i32) {
    %c0_i32 = arith.constant 0 : i32
    %c0_i32_0 = arith.constant 0 : i32
    %c0_i32_1 = arith.constant 0 : i32
    return %c0_i32, %c0_i32_0 : i32, i32
  }
}

</mosaic_0001>

<bundles_post_ra>
// kernel: tpu_custom_call.1
= control target key start
LH: loop header
LB: loop body
LE: loop exit
PB: predicated region body
PF: predicated region fallthrough
CT: control target
= control target key end

     0   :  { %14 = vsyncpa [#allocation3], 0  ;;  %s1676_s0 = inlined_call_operand.hbm [shape: bf16[128,128], index: 0, kind: input, shape index: {}]   ;;  %s1677_s1 = inlined_call_operand.hbm [shape: bf16[128,128], index: 1, kind: input, shape index: {}]   ;;  %s1678_s2 = inlined_call_operand.hbm [shape: bf16[8,128], index: 2, kind: input, shape index: {}]   ;;  %s1679_s3 = inlined_call_operand.hbm [shape: bf16[128,128], index: 3, kind: input, shape index: {}]   ;;  %s1680_s4 = inlined_call_operand.vmem [shape: f32[1,128], index: 4, kind: input, shape index: {}]   ;;  %s1681_s5 = inlined_call_operand.hbm [shape: bf16[128,128], index: 5, kind: input, shape index: {}]   ;;  %s1682_s6 = inlined_call_operand.vmem [shape: f32[1,128], index: 6, kind: input, shape index: {}]   ;;  %s1683_s7 = inlined_call_operand.hbm [shape: bf16[128,128], index: 7, kind: input, shape index: {}]   ;;  %s1684_s8 = inlined_call_operand.vmem [shape: f32[1,128], index: 8, kind: input, shape index: {}]   ;;  %s1685_s9 = inlined_call_operand.hbm [shape: f32[8,128], index: 9, kind: output, shape index: {}]  }
   0x1   :  { %15 = vsyncpa [#allocation6], 0 }
   0x2   :  { %16 = vsyncpa [#allocation9], 0 }
   0x3   :  { %17 = vsyncpa [#allocation12], 0 }
   0x4   :  { %18 = vsyncpa [#allocation4], 0  ;;  %s1520_s30 = smov [#allocation5]   ;;  %s1521_s11 = smov [#allocation8]  }
   0x5   :  { %s36_s10 = sshll.u32 %s1520_s30, 4  ;;  %s58_s12 = sshll.u32 %s1521_s11, 4  ;;  %s37_s10 = int_to_ptr.vmem [resolvable:$true] %s36_s10  ;;  %s59_s12 = int_to_ptr.vmem [resolvable:$true] %s58_s12 }
   0x6   :  { %s1378_s13 = scalar_lea.vmem %s37_s10, 1024  ;;  %p1383_p1 = scmp.lt.s32.totalorder %s37_s10, %s37_s10 }
   0x7   :  { %p1379_p0 = scmp.ne.s32.totalorder %s37_s10, %s1378_s13  ;;  %p1384_p2 = scmp.lt.s32.totalorder %s1378_s13, %s1378_s13 }
   0x9   :  { %p1385_p3 = por %p1384_p2, %p1383_p1 }
   0xb   :  { %p1386_p4 = pnand %p1385_p3, %p1379_p0 }
   0xd   :  { %1389 = shalt.err (!%p1386_p4)
}
   0xe   :  { %s1522_s14 = smov 64   ;;  %s1523_s15 = smov 4  }
   0xf   :  { %42 = dma.hbm_to_vmem [thread:$0]  %s1677_s1, 1024, %s37_s10, [#allocation6], %s1522_s14, %s1522_s14, %s1523_s15  }
  0x10   :  { %s1398_s18 = scalar_lea.vmem %s59_s12, 1024  ;;  %p1403_p6 = scmp.lt.s32.totalorder %s59_s12, %s59_s12 }
  0x11   :  { %p1399_p5 = scmp.ne.s32.totalorder %s59_s12, %s1398_s18  ;;  %p1404_p7 = scmp.lt.s32.totalorder %s1398_s18, %s1398_s18 }
  0x13   :  { %p1405_p8 = por %p1404_p7, %p1403_p6 }
  0x15   :  { %p1406_p9 = pnand %p1405_p8, %p1399_p5 }
  0x17   :  { %1409 = shalt.err (!%p1406_p9)
}
  0x18   :  { %64 = dma.hbm_to_vmem [thread:$0]  %s1679_s3, 1024, %s59_s12, [#allocation9], %s1522_s14, %s1522_s14, %s1523_s15  }
  0x19   :  { %s1524_s21 = smov [#allocation2]   ;;  %s1525_s23 = smov [#allocation7]  }
  0x1a   :  { %s24_s22 = sshll.u32 %s1524_s21, 4  ;;  %s49_s24 = sshll.u32 %s1525_s23, 4  ;;  %s25_s22 = int_to_ptr.vmem [resolvable:$true] %s24_s22  ;;  %s50_s24 = int_to_ptr.vmem [resolvable:$true] %s49_s24 }
  0x1b   :  { %s1418_s1 = scalar_lea.vmem %s25_s22, 1024  ;;  %p1423_p11 = scmp.lt.s32.totalorder %s25_s22, %s25_s22 }
  0x1c   :  { %p1419_p10 = scmp.ne.s32.totalorder %s25_s22, %s1418_s1  ;;  %p1424_p12 = scmp.lt.s32.totalorder %s1418_s1, %s1418_s1 }
  0x1e   :  { %p1425_p13 = por %p1424_p12, %p1423_p11 }
  0x20   :  { %p1426_p0 = pnand %p1425_p13, %p1419_p10 }
  0x22   :  { %1429 = shalt.err (!%p1426_p0)
}
  0x23   :  { %30 = dma.hbm_to_vmem [thread:$0]  %s1676_s0, 1024, %s25_s22, [#allocation3], %s1522_s14, %s1522_s14, %s1523_s15  }
  0x24   :  { %s1438_s3 = scalar_lea.vmem %s50_s24, 64  ;;  %p1443_p2 = scmp.lt.s32.totalorder %s50_s24, %s50_s24 }
  0x25   :  { %p1439_p1 = scmp.ne.s32.totalorder %s50_s24, %s1438_s3  ;;  %p1444_p3 = scmp.lt.s32.totalorder %s1438_s3, %s1438_s3 }
  0x27   :  { %p1445_p4 = por %p1444_p3, %p1443_p2 }
  0x29   :  { %p1446_p5 = pnand %p1445_p4, %p1439_p1 }
  0x2b   :  { %1449 = shalt.err (!%p1446_p5)
}
  0x2c   :  { %52 = dma.hbm_to_vmem [thread:$0]  %s1678_s2, 64, %s50_s24, [#allocation6]  }
  0x2d   :  { %s1526_s29 = smov [#allocation10]   ;;  %s1527_s10 = smov [#allocation11]  }
  0x2e   :  { %s72_s30 = sshll.u32 %s1526_s29, 4  ;;  %s86_s11 = sshll.u32 %s1527_s10, 4  ;;  %s73_s30 = int_to_ptr.vmem [resolvable:$true] %s72_s30  ;;  %s87_s11 = int_to_ptr.vmem [resolvable:$true] %s86_s11 }
  0x2f   :  { %s1458_s12 = scalar_lea.vmem %s73_s30, 1024  ;;  %p1463_p7 = scmp.lt.s32.totalorder %s73_s30, %s73_s30 }
  0x30   :  { %p1459_p6 = scmp.ne.s32.totalorder %s73_s30, %s1458_s12  ;;  %p1464_p8 = scmp.lt.s32.totalorder %s1458_s12, %s1458_s12 }
  0x32   :  { %p1465_p9 = por %p1464_p8, %p1463_p7 }
  0x34   :  { %p1466_p10 = pnand %p1465_p9, %p1459_p6 }
  0x36   :  { %1469 = shalt.err (!%p1466_p10)
}
  0x37   :  { %78 = dma.hbm_to_vmem [thread:$0]  %s1681_s5, 1024, %s73_s30, [#allocation9], %s1522_s14, %s1522_s14, %s1523_s15  }
  0x38   :  { %s1478_s2 = scalar_lea.vmem %s87_s11, 1024  ;;  %p1483_p12 = scmp.lt.s32.totalorder %s87_s11, %s87_s11 }
  0x39   :  { %p1479_p11 = scmp.ne.s32.totalorder %s87_s11, %s1478_s2  ;;  %p1484_p13 = scmp.lt.s32.totalorder %s1478_s2, %s1478_s2 }
  0x3b   :  { %p1485_p0 = por %p1484_p13, %p1483_p12 }
  0x3d   :  { %p1486_p1 = pnand %p1485_p0, %p1479_p11 }
  0x3f   :  { %1489 = shalt.err (!%p1486_p1)
}
  0x40   :  { %92 = dma.hbm_to_vmem [thread:$0]  %s1683_s7, 1024, %s87_s11, [#allocation12], %s1522_s14, %s1522_s14, %s1523_s15  }
  0x41   :  { %1510 = dma.done.wait [#allocation3], 1024  }
  0x42   :  { %1511 = vsyncadd [#allocation3], 4294966272 }
  0x43   :  { %1512 = dma.done.wait [#allocation6], 1088  }
  0x44   :  { %1513 = vsyncadd [#allocation6], 4294966208 }
  0x45   :  { %1514 = dma.done.wait [#allocation9], 2048  }
  0x46   :  { %1515 = vsyncadd [#allocation9], 4294965248 }
  0x47   :  { %1516 = dma.done.wait [#allocation12], 1024  }
  0x48   :  { %1517 = vsyncadd [#allocation12], 4294966272  ;;  %v1326_v0 = vld [vmem:[#allocation8 + $0x38] sm:$0xff]   ;;  %v1327_v1 = vld [vmem:[#allocation8 + $0x30] sm:$0xff]   ;;  %vm1529_vm0 = vmmov 0   ;;  %s1530_s18 = smov [#allocation13]  }
  0x49   :  { %1147 = vmatprep.subr.bf16.mxu0 %v1326_v0  ;;  %v1328_v2 = vld [vmem:[#allocation8 + $0x28] sm:$0xff]   ;;  %v1329_v3 = vld [vmem:[#allocation8 + $0x20] sm:$0xff]   ;;  %v1330_v5 = vld [vmem:[#allocation8 + $0x18] sm:$0xff]   ;;  %s1010_s19 = sshll.u32 %s1530_s18, 4  ;;  %s1011_s19 = int_to_ptr.vmem [resolvable:$true] %s1010_s19 }
  0x4a   :  { %1148 = vmatpush3.bf16.msra.mxu0 %v1326_v0  ;;  %v1334_v4 = vld [vmem:[#allocation5] sm:$0xff]   ;;  %v1331_v6 = vld [vmem:[#allocation8 + $0x10] sm:$0xff]   ;;  %v1332_v7 = vld [vmem:[#allocation8 + $0x8] sm:$0xff]   ;;  %p1495_p3 = scmp.lt.s32.totalorder %s1011_s19, %s1011_s19 }
  0x4b   :  { %1149 = vmatprep.subr.bf16.mxu0 %v1327_v1  ;;  %1163 = vmatprep.mubr.bf16.mxu0 %v1334_v4  ;;  %v1333_v8 = vld [vmem:[#allocation8] sm:$0xff]   ;;  %v1336_v10 = vld [vmem:[#allocation5 + $0x10] sm:$0xff]   ;;  %v1337_v11 = vld [vmem:[#allocation5 + $0x18] sm:$0xff]  }
  0x4c   :  { %v1335_v9 = vld [vmem:[#allocation5 + $0x8] sm:$0xff]   ;;  %v1338_v12 = vld [vmem:[#allocation5 + $0x20] sm:$0xff]   ;;  %v1340_v14 = vld [vmem:[#allocation5 + $0x30] sm:$0xff]  }
  0x4d   :  { %v1339_v13 = vld [vmem:[#allocation5 + $0x28] sm:$0xff]   ;;  %v1341_v15 = vld [vmem:[#allocation5 + $0x38] sm:$0xff]   ;;  %v1614_v16 = vld [vmem:[#allocation2] sm:$0xff]  }
  0x4e   :  { %1150 = vmatpush3.bf16.msra.mxu0 %v1327_v1  ;;  %1195 = vmatprep.mubr.bf16.mxu1 %v1614_v16  ;;  %v1350_v17 = vld [vmem:[#allocation10 + $0x38] sm:$0xff]   ;;  %v1351_v18 = vld [vmem:[#allocation10 + $0x30] sm:$0xff]   ;;  %v1352_v19 = vld [vmem:[#allocation10 + $0x28] sm:$0xff]  }
  0x4f   :  { %1151 = vmatprep.subr.bf16.mxu0 %v1328_v2  ;;  %v1353_v20 = vld [vmem:[#allocation10 + $0x20] sm:$0xff]   ;;  %v1354_v21 = vld [vmem:[#allocation10 + $0x18] sm:$0xff]   ;;  %v1619_v47 = vld [vmem:[#allocation2 + $0x10] sm:$0xff]  }
  0x50   :  { %v1617_v46 = vld [vmem:[#allocation2 + $0x8] sm:$0xff]   ;;  %v1623_v48 = vld [vmem:[#allocation2 + $0x18] sm:$0xff]   ;;  %v1625_v49 = vld [vmem:[#allocation2 + $0x20] sm:$0xff]  }
  0x51   :  { %v1629_v50 = vld [vmem:[#allocation2 + $0x28] sm:$0xff]   ;;  %v1631_v51 = vld [vmem:[#allocation2 + $0x30] sm:$0xff]   ;;  %v1635_v52 = vld [vmem:[#allocation2 + $0x38] sm:$0xff]  }
  0x52   :  { %1152 = vmatpush3.bf16.msra.mxu0 %v1328_v2  ;;  %v1355_v53 = vld [vmem:[#allocation10 + $0x10] sm:$0xff]   ;;  %v1356_v54 = vld [vmem:[#allocation10 + $0x8] sm:$0xff]   ;;  %v1357_v55 = vld [vmem:[#allocation10] sm:$0xff]  }
  0x53   :  { %1153 = vmatprep.subr.bf16.mxu0 %v1329_v3  ;;  %v1038_v58 = vld [vmem:[%s1680_s4] ss:$0 sm:$0xff] }
  0x56   :  { %1154 = vmatpush3.bf16.msra.mxu0 %v1329_v3 }
  0x57   :  { %1155 = vmatprep.subr.bf16.mxu0 %v1330_v5 }
  0x5a   :  { %1156 = vmatpush3.bf16.msra.mxu0 %v1330_v5 }
  0x5b   :  { %1157 = vmatprep.subr.bf16.mxu0 %v1331_v6 }
  0x5e   :  { %1158 = vmatpush3.bf16.msra.mxu0 %v1331_v6 }
  0x5f   :  { %1159 = vmatprep.subr.bf16.mxu0 %v1332_v7 }
  0x62   :  { %1160 = vmatpush3.bf16.msra.mxu0 %v1332_v7 }
  0x63   :  { %1161 = vmatprep.subr.bf16.mxu0 %v1333_v8 }
  0x66   :  { %1162 = vmatpush3.bf16.msra.mxu0 %v1333_v8 }
  0x67   :  { %1211 = vmatprep.subr.bf16.mxu0 %v1350_v17 }
  0x69   :  { %1164 = vmatmul.mubr.bf16.vlgmr.msra.gmra.mxu0 %v1335_v9 }
  0x6a   :  { %1167 = vmatprep.mubr.bf16.mxu0 %v1336_v10  ;;  %1212 = vmatpush3.bf16.msra.mxu0 %v1350_v17 }
  0x6b   :  { %1213 = vmatprep.subr.bf16.mxu0 %v1351_v18 }
  0x6e   :  { %1214 = vmatpush3.bf16.msra.mxu0 %v1351_v18 }
  0x6f   :  { %1215 = vmatprep.subr.bf16.mxu0 %v1352_v19 }
  0x71   :  { %1168 = vmatmul.mubr.bf16.gmra.mxu0 %v1337_v11 }
  0x72   :  { %1171 = vmatprep.mubr.bf16.mxu0 %v1338_v12  ;;  %1216 = vmatpush3.bf16.msra.mxu0 %v1352_v19 }
  0x73   :  { %1217 = vmatprep.subr.bf16.mxu0 %v1353_v20 }
  0x76   :  { %1218 = vmatpush3.bf16.msra.mxu0 %v1353_v20 }
  0x77   :  { %1219 = vmatprep.subr.bf16.mxu0 %v1354_v21 }
  0x79   :  { %1172 = vmatmul.mubr.bf16.gmra.mxu0 %v1339_v13 }
  0x7a   :  { %1175 = vmatprep.mubr.bf16.mxu0 %v1340_v14  ;;  %1220 = vmatpush3.bf16.msra.mxu0 %v1354_v21 }
  0x7b   :  { %1221 = vmatprep.subr.bf16.mxu0 %v1355_v53 }
  0x7e   :  { %1222 = vmatpush3.bf16.msra.mxu0 %v1355_v53 }
  0x7f   :  { %1223 = vmatprep.subr.bf16.mxu0 %v1356_v54 }
  0x81   :  { %1176 = vmatmul.mubr.bf16.gmra.mxu0 %v1341_v15 }
  0x82   :  { %1224 = vmatpush3.bf16.msra.mxu0 %v1356_v54 }
  0x83   :  { %1225 = vmatprep.subr.bf16.mxu0 %v1357_v55 }
  0x86   :  { %1226 = vmatpush3.bf16.msra.mxu0 %v1357_v55 }
 0x129   :  { %v1165_v22 = vpop.f32.mrf.mxu0 }
 0x12b   :  { %v293_v23 = vpop.f32.mrf.mxu0 }
 0x12d   :  { %v1166_v24 = vpop.f32.mrf.mxu0 }
 0x12e   :  { %v357_v44 = vpack.c.bf16 %v1166_v24, %v1165_v22 }
 0x12f   :  { %v296_v25 = vpop.f32.mrf.mxu0 }
 0x130   :  { %v356_v45 = vpack.c.bf16 %v296_v25, %v293_v23 }
 0x131   :  { %v1169_v26 = vpop.f32.mrf.mxu0 }
 0x133   :  { %v309_v27 = vpop.f32.mrf.mxu0 }
 0x135   :  { %v1170_v28 = vpop.f32.mrf.mxu0 }
 0x136   :  { %v359_v42 = vpack.c.bf16 %v1170_v28, %v1169_v26 }
 0x137   :  { %v312_v29 = vpop.f32.mrf.mxu0 }
 0x138   :  { %v358_v43 = vpack.c.bf16 %v312_v29, %v309_v27 }
 0x139   :  { %v1173_v30 = vpop.f32.mrf.mxu0 }
 0x13b   :  { %v325_v31 = vpop.f32.mrf.mxu0 }
 0x13d   :  { %v1174_v32 = vpop.f32.mrf.mxu0 }
 0x13e   :  { %v361_v40 = vpack.c.bf16 %v1174_v32, %v1173_v30 }
 0x13f   :  { %v328_v33 = vpop.f32.mrf.mxu0 }
 0x140   :  { %v360_v41 = vpack.c.bf16 %v328_v33, %v325_v31 }
 0x141   :  { %v1177_v34 = vpop.f32.mrf.mxu0 }
 0x143   :  { %v341_v35 = vpop.f32.mrf.mxu0 }
 0x145   :  { %v1178_v36 = vpop.f32.mrf.mxu0 }
 0x146   :  { %v363_v37 = vpack.c.bf16 %v1178_v36, %v1177_v34 }
 0x147   :  { %v344_v38 = vpop.f32.mrf.mxu0 }
 0x148   :  { %v362_v39 = vpack.c.bf16 %v344_v38, %v341_v35  ;;  %1179 = vmatprep.subr.bf16.mxu1 %v363_v37 }
 0x149   :  { %1180 = vmatpush3.bf16.msra.mxu1 %v363_v37 }
 0x14a   :  { %1181 = vmatprep.subr.bf16.mxu1 %v362_v39 }
 0x14d   :  { %1182 = vmatpush3.bf16.msra.mxu1 %v362_v39 }
 0x14e   :  { %1183 = vmatprep.subr.bf16.mxu1 %v361_v40 }
 0x151   :  { %1184 = vmatpush3.bf16.msra.mxu1 %v361_v40 }
 0x152   :  { %1185 = vmatprep.subr.bf16.mxu1 %v360_v41 }
 0x155   :  { %1186 = vmatpush3.bf16.msra.mxu1 %v360_v41 }
 0x156   :  { %1187 = vmatprep.subr.bf16.mxu1 %v359_v42 }
 0x159   :  { %1188 = vmatpush3.bf16.msra.mxu1 %v359_v42 }
 0x15a   :  { %1189 = vmatprep.subr.bf16.mxu1 %v358_v43 }
 0x15d   :  { %1190 = vmatpush3.bf16.msra.mxu1 %v358_v43 }
 0x15e   :  { %1191 = vmatprep.subr.bf16.mxu1 %v357_v44 }
 0x161   :  { %1192 = vmatpush3.bf16.msra.mxu1 %v357_v44 }
 0x162   :  { %1193 = vmatprep.subr.bf16.mxu1 %v356_v45 }
 0x165   :  { %1194 = vmatpush3.bf16.msra.mxu1 %v356_v45 }
 0x168   :  { %1196 = vmatmul.mubr.bf16.vlgmr.msra.gmra.mxu1 %v1617_v46 }
 0x169   :  { %1199 = vmatprep.mubr.bf16.mxu1 %v1619_v47 }
 0x170   :  { %1200 = vmatmul.mubr.bf16.gmra.mxu1 %v1623_v48 }
 0x171   :  { %1203 = vmatprep.mubr.bf16.mxu1 %v1625_v49 }
 0x178   :  { %1204 = vmatmul.mubr.bf16.gmra.mxu1 %v1629_v50 }
 0x179   :  { %1207 = vmatprep.mubr.bf16.mxu1 %v1631_v51 }
 0x180   :  { %1208 = vmatmul.mubr.bf16.gmra.mxu1 %v1635_v52 }
 0x181   :  { %1259 = vmatprep.mubr.bf16.mxu1 %v1614_v16 }
 0x228   :  { %v1197_v56 = vpop.f32.mrf.mxu1 }
 0x229   :  { %v461_v62 = vadd.f32 %v1197_v56, %v1038_v58 }
 0x22a   :  { %v452_v57 = vpop.f32.mrf.mxu1 }
 0x22b   :  { %v453_v60 = vadd.f32 %v1038_v58, %v452_v57  ;;  %v517_v5 = vmax.f32 %v461_v62, 0.0 }
 0x22c   :  { %v1198_v59 = vpop.f32.mrf.mxu1 }
 0x22d   :  { %v464_v61 = vadd.f32 %v1198_v59, %v1038_v58  ;;  %v515_v3 = vmax.f32 %v453_v60, 0.0 }
 0x22e   :  { %v455_v63 = vpop.f32.mrf.mxu1 }
 0x22f   :  { %v456_v0 = vadd.f32 %v1038_v58, %v455_v63  ;;  %v518_v1 = vmax.f32 %v464_v61, 0.0 }
 0x230   :  { %v1201_v2 = vpop.f32.mrf.mxu1 }
 0x231   :  { %v516_v4 = vmax.f32 %v456_v0, 0.0  ;;  %v532_v8 = vpack.c.bf16 %v518_v1, %v517_v5  ;;  %v477_v12 = vadd.f32 %v1201_v2, %v1038_v58 }
 0x232   :  { %v468_v6 = vpop.f32.mrf.mxu1 }
 0x233   :  { %v531_v7 = vpack.c.bf16 %v516_v4, %v515_v3  ;;  %v469_v10 = vadd.f32 %v1038_v58, %v468_v6  ;;  %v521_v19 = vmax.f32 %v477_v12, 0.0 }
 0x234   :  { %v1202_v9 = vpop.f32.mrf.mxu1 }
 0x235   :  { %v480_v11 = vadd.f32 %v1202_v9, %v1038_v58  ;;  %1227 = vmatprep.mubr.bf16.mxu0 %v531_v7  ;;  %v519_v17 = vmax.f32 %v469_v10, 0.0 }
 0x236   :  { %v471_v13 = vpop.f32.mrf.mxu1  ;;  %1228 = vmatmul.mubr.bf16.vlgmr.msra.gmra.mxu0 %v532_v8 }
 0x237   :  { %v472_v14 = vadd.f32 %v1038_v58, %v471_v13  ;;  %v522_v15 = vmax.f32 %v480_v11, 0.0 }
 0x238   :  { %v1205_v16 = vpop.f32.mrf.mxu1 }
 0x239   :  { %v520_v18 = vmax.f32 %v472_v14, 0.0  ;;  %v534_v22 = vpack.c.bf16 %v522_v15, %v521_v19  ;;  %v493_v26 = vadd.f32 %v1205_v16, %v1038_v58  ;;  %v1528_v16 = vmov 0.0  }
 0x23a   :  { %v484_v20 = vpop.f32.mrf.mxu1  ;;  %1275 = vmatprep.subr.bf16.mxu0 %v1528_v16 }
 0x23b   :  { %v533_v21 = vpack.c.bf16 %v520_v18, %v519_v17  ;;  %v485_v24 = vadd.f32 %v1038_v58, %v484_v20  ;;  %v525_v33 = vmax.f32 %v493_v26, 0.0 }
 0x23c   :  { %v1206_v23 = vpop.f32.mrf.mxu1 }
 0x23d   :  { %v496_v25 = vadd.f32 %v1206_v23, %v1038_v58  ;;  %1231 = vmatprep.mubr.bf16.mxu0 %v533_v21  ;;  %v523_v31 = vmax.f32 %v485_v24, 0.0 }
 0x23e   :  { %v487_v27 = vpop.f32.mrf.mxu1  ;;  %1232 = vmatmul.mubr.bf16.gmra.mxu0 %v534_v22 }
 0x23f   :  { %v488_v28 = vadd.f32 %v1038_v58, %v487_v27  ;;  %v526_v29 = vmax.f32 %v496_v25, 0.0 }
 0x240   :  { %v1209_v30 = vpop.f32.mrf.mxu1 }
 0x241   :  { %v524_v32 = vmax.f32 %v488_v28, 0.0  ;;  %v536_v36 = vpack.c.bf16 %v526_v29, %v525_v33  ;;  %v509_v40 = vadd.f32 %v1209_v30, %v1038_v58  ;;  %v1055_v30 = vld [vmem:[%s1682_s6] ss:$0 sm:$0xff] }
 0x242   :  { %v500_v34 = vpop.f32.mrf.mxu1 }
 0x243   :  { %v535_v35 = vpack.c.bf16 %v524_v32, %v523_v31  ;;  %v501_v38 = vadd.f32 %v1038_v58, %v500_v34  ;;  %v529_v53 = vmax.f32 %v509_v40, 0.0 }
 0x244   :  { %v1210_v37 = vpop.f32.mrf.mxu1 }
 0x245   :  { %v512_v39 = vadd.f32 %v1210_v37, %v1038_v58  ;;  %1235 = vmatprep.mubr.bf16.mxu0 %v535_v35  ;;  %v527_v44 = vmax.f32 %v501_v38, 0.0 }
 0x246   :  { %v503_v41 = vpop.f32.mrf.mxu1  ;;  %1236 = vmatmul.mubr.bf16.gmra.mxu0 %v536_v36 }
 0x247   :  { %v504_v42 = vadd.f32 %v1038_v58, %v503_v41  ;;  %v530_v43 = vmax.f32 %v512_v39, 0.0 }
 0x249   :  { %v528_v45 = vmax.f32 %v504_v42, 0.0  ;;  %v538_v55 = vpack.c.bf16 %v530_v43, %v529_v53 }
 0x24b   :  { %v537_v54 = vpack.c.bf16 %v528_v45, %v527_v44 }
 0x24d   :  { %1239 = vmatprep.mubr.bf16.mxu0 %v537_v54 }
 0x24e   :  { %1240 = vmatmul.mubr.bf16.gmra.mxu0 %v538_v55 }
 0x24f   :  { %1291 = vmatprep.mubr.msk.bf16.mxu0 %vm1529_vm0, %v1528_v16 }
 0x2f6   :  { %v1229_v56 = vpop.f32.mrf.mxu0 }
 0x2f8   :  { %v638_v57 = vpop.f32.mrf.mxu0 }
 0x2fa   :  { %v1230_v59 = vpop.f32.mrf.mxu0 }
 0x2fb   :  { %v702_v14 = vpack.c.bf16 %v1230_v59, %v1229_v56 }
 0x2fc   :  { %v641_v60 = vpop.f32.mrf.mxu0 }
 0x2fd   :  { %v701_v15 = vpack.c.bf16 %v641_v60, %v638_v57 }
 0x2fe   :  { %v1233_v61 = vpop.f32.mrf.mxu0 }
 0x300   :  { %v654_v62 = vpop.f32.mrf.mxu0 }
 0x302   :  { %v1234_v63 = vpop.f32.mrf.mxu0 }
 0x303   :  { %v704_v12 = vpack.c.bf16 %v1234_v63, %v1233_v61 }
 0x304   :  { %v657_v0 = vpop.f32.mrf.mxu0 }
 0x305   :  { %v703_v13 = vpack.c.bf16 %v657_v0, %v654_v62 }
 0x306   :  { %v1237_v1 = vpop.f32.mrf.mxu0 }
 0x308   :  { %v670_v2 = vpop.f32.mrf.mxu0 }
 0x30a   :  { %v1238_v3 = vpop.f32.mrf.mxu0 }
 0x30b   :  { %v706_v10 = vpack.c.bf16 %v1238_v3, %v1237_v1 }
 0x30c   :  { %v673_v58 = vpop.f32.mrf.mxu0 }
 0x30d   :  { %v705_v11 = vpack.c.bf16 %v673_v58, %v670_v2 }
 0x30e   :  { %v1241_v4 = vpop.f32.mrf.mxu0 }
 0x310   :  { %v686_v5 = vpop.f32.mrf.mxu0 }
 0x312   :  { %v1242_v6 = vpop.f32.mrf.mxu0 }
 0x313   :  { %v708_v7 = vpack.c.bf16 %v1242_v6, %v1241_v4 }
 0x314   :  { %v689_v8 = vpop.f32.mrf.mxu0 }
 0x315   :  { %v707_v9 = vpack.c.bf16 %v689_v8, %v686_v5  ;;  %1243 = vmatprep.subr.bf16.mxu1 %v708_v7 }
 0x316   :  { %1244 = vmatpush3.bf16.msra.mxu1 %v708_v7 }
 0x317   :  { %1245 = vmatprep.subr.bf16.mxu1 %v707_v9 }
 0x31a   :  { %1246 = vmatpush3.bf16.msra.mxu1 %v707_v9 }
 0x31b   :  { %1247 = vmatprep.subr.bf16.mxu1 %v706_v10 }
 0x31e   :  { %1248 = vmatpush3.bf16.msra.mxu1 %v706_v10 }
 0x31f   :  { %1249 = vmatprep.subr.bf16.mxu1 %v705_v11 }
 0x322   :  { %1250 = vmatpush3.bf16.msra.mxu1 %v705_v11 }
 0x323   :  { %1251 = vmatprep.subr.bf16.mxu1 %v704_v12 }
 0x326   :  { %1252 = vmatpush3.bf16.msra.mxu1 %v704_v12 }
 0x327   :  { %1253 = vmatprep.subr.bf16.mxu1 %v703_v13 }
 0x32a   :  { %1254 = vmatpush3.bf16.msra.mxu1 %v703_v13 }
 0x32b   :  { %1255 = vmatprep.subr.bf16.mxu1 %v702_v14 }
 0x32e   :  { %1256 = vmatpush3.bf16.msra.mxu1 %v702_v14 }
 0x32f   :  { %1257 = vmatprep.subr.bf16.mxu1 %v701_v15 }
 0x332   :  { %1258 = vmatpush3.bf16.msra.mxu1 %v701_v15 }
 0x333   :  { %1295 = vmatprep.subr.bf16.mxu1 %v1528_v16 }
 0x335   :  { %1260 = vmatmul.mubr.bf16.vlgmr.msra.gmra.mxu1 %v1617_v46  ;;  %v1358_v46 = vld [vmem:[#allocation11 + $0x38] sm:$0xff]  }
 0x336   :  { %1263 = vmatprep.mubr.bf16.mxu1 %v1619_v47  ;;  %1296 = vmatpush3.bf16.msra.mxu1 %v1358_v46  ;;  %v1359_v47 = vld [vmem:[#allocation11 + $0x30] sm:$0xff]  }
 0x337   :  { %1297 = vmatprep.subr.bf16.mxu1 %v1528_v16 }
 0x33a   :  { %1298 = vmatpush3.bf16.msra.mxu1 %v1359_v47  ;;  %v836_v47 = vld [vmem:[#allocation7] sm:$0xf] }
 0x33b   :  { %1299 = vmatprep.subr.bf16.mxu1 %v1528_v16 }
 0x33d   :  { %1264 = vmatmul.mubr.bf16.gmra.mxu1 %v1623_v48  ;;  %v1360_v48 = vld [vmem:[#allocation11 + $0x28] sm:$0xff]  }
 0x33e   :  { %1267 = vmatprep.mubr.bf16.mxu1 %v1625_v49  ;;  %1300 = vmatpush3.bf16.msra.mxu1 %v1360_v48  ;;  %v1361_v49 = vld [vmem:[#allocation11 + $0x20] sm:$0xff]  }
 0x33f   :  { %1301 = vmatprep.subr.bf16.mxu1 %v1528_v16  ;;  %v1365_v48 = vld [vmem:[#allocation11] sm:$0xff]  }
 0x342   :  { %1302 = vmatpush3.bf16.msra.mxu1 %v1361_v49 }
 0x343   :  { %1303 = vmatprep.subr.bf16.mxu1 %v1528_v16 }
 0x345   :  { %1268 = vmatmul.mubr.bf16.gmra.mxu1 %v1629_v50  ;;  %v1362_v50 = vld [vmem:[#allocation11 + $0x18] sm:$0xff]  }
 0x346   :  { %1271 = vmatprep.mubr.bf16.mxu1 %v1631_v51  ;;  %1304 = vmatpush3.bf16.msra.mxu1 %v1362_v50  ;;  %v1363_v51 = vld [vmem:[#allocation11 + $0x10] sm:$0xff]  }
 0x347   :  { %1305 = vmatprep.subr.bf16.mxu1 %v1528_v16 }
 0x34a   :  { %1306 = vmatpush3.bf16.msra.mxu1 %v1363_v51 }
 0x34b   :  { %1307 = vmatprep.subr.bf16.mxu1 %v1528_v16 }
 0x34d   :  { %1272 = vmatmul.mubr.bf16.gmra.mxu1 %v1635_v52  ;;  %v1364_v52 = vld [vmem:[#allocation11 + $0x8] sm:$0xff]  }
 0x34e   :  { %1311 = vmatprep.mubr.msk.bf16.mxu1 %vm1529_vm0, %v1528_v16  ;;  %1308 = vmatpush3.bf16.msra.mxu1 %v1364_v52 }
 0x34f   :  { %1309 = vmatprep.subr.bf16.mxu1 %v1528_v16 }
 0x352   :  { %1310 = vmatpush3.bf16.msra.mxu1 %v1365_v48 }
 0x3f5   :  { %v1261_v17 = vpop.f32.mrf.mxu1 }
 0x3f6   :  { %v758_v6 = vadd.f32 %v1261_v17, %v1055_v30 }
 0x3f7   :  { %v749_v18 = vpop.f32.mrf.mxu1 }
 0x3f8   :  { %v814_v11 = vmax.f32 %v758_v6, 0.0  ;;  %v750_v12 = vadd.f32 %v1055_v30, %v749_v18  ;;  %v989_v18 = vlaneseq }
 0x3f9   :  { %v1262_v19 = vpop.f32.mrf.mxu1 }
 0x3fa   :  { %v761_v58 = vadd.f32 %v1262_v19, %v1055_v30  ;;  %v812_v15 = vmax.f32 %v750_v12, 0.0  ;;  %v990_v19 = vand.u32 127, %v989_v18 }
 0x3fb   :  { %v752_v20 = vpop.f32.mrf.mxu1 }
 0x3fc   :  { %v815_v8 = vmax.f32 %v761_v58, 0.0  ;;  %v753_v9 = vadd.f32 %v1055_v30, %v752_v20  ;;  %v1056_v20 = vld [vmem:[%s1684_s8] ss:$0 sm:$0xff]  ;;  %vm991_vm1 = vcmp.lt.s32.totalorder %v990_v19, 4  ;;  %s1490_s8 = scalar_lea.vmem %s1011_s19, 128 }
 0x3fd   :  { %v1265_v21 = vpop.f32.mrf.mxu1  ;;  %p1491_p2 = scmp.ne.s32.totalorder %s1011_s19, %s1490_s8  ;;  %p1496_p4 = scmp.lt.s32.totalorder %s1490_s8, %s1490_s8 }
 0x3fe   :  { %v774_v61 = vadd.f32 %v1265_v21, %v1055_v30  ;;  %v829_v13 = vpack.c.bf16 %v815_v8, %v814_v11  ;;  %v813_v14 = vmax.f32 %v753_v9, 0.0 }
 0x3ff   :  { %v765_v22 = vpop.f32.mrf.mxu1  ;;  %p1497_p5 = por %p1496_p4, %p1495_p3 }
 0x400   :  { %v818_v2 = vmax.f32 %v774_v61, 0.0  ;;  %v766_v3 = vadd.f32 %v1055_v30, %v765_v22  ;;  %v828_v46 = vpack.c.bf16 %v813_v14, %v812_v15 }
 0x401   :  { %v1266_v23 = vpop.f32.mrf.mxu1  ;;  %p1498_p6 = pnand %p1497_p5, %p1491_p2 }
 0x402   :  { %v777_v57 = vadd.f32 %v1266_v23, %v1055_v30  ;;  %v816_v7 = vmax.f32 %v766_v3, 0.0 }
 0x403   :  { %v768_v24 = vpop.f32.mrf.mxu1 }
 0x404   :  { %v819_v63 = vmax.f32 %v777_v57, 0.0  ;;  %v769_v0 = vadd.f32 %v1055_v30, %v768_v24 }
 0x405   :  { %v1269_v25 = vpop.f32.mrf.mxu1 }
 0x406   :  { %v790_v43 = vadd.f32 %v1269_v25, %v1055_v30  ;;  %v831_v4 = vpack.c.bf16 %v819_v63, %v818_v2  ;;  %v817_v5 = vmax.f32 %v769_v0, 0.0 }
 0x407   :  { %v781_v26 = vpop.f32.mrf.mxu1 }
 0x408   :  { %v822_v55 = vmax.f32 %v790_v43, 0.0  ;;  %v782_v56 = vadd.f32 %v1055_v30, %v781_v26  ;;  %v830_v10 = vpack.c.bf16 %v817_v5, %v816_v7 }
 0x409   :  { %v1270_v27 = vpop.f32.mrf.mxu1 }
 0x40a   :  { %v793_v40 = vadd.f32 %v1270_v27, %v1055_v30  ;;  %v820_v62 = vmax.f32 %v782_v56, 0.0 }
 0x40b   :  { %v784_v28 = vpop.f32.mrf.mxu1 }
 0x40c   :  { %v823_v45 = vmax.f32 %v793_v40, 0.0  ;;  %v785_v53 = vadd.f32 %v1055_v30, %v784_v28 }
 0x40d   :  { %v1273_v29 = vpop.f32.mrf.mxu1 }
 0x40e   :  { %v806_v32 = vadd.f32 %v1273_v29, %v1055_v30  ;;  %v833_v59 = vpack.c.bf16 %v823_v45, %v822_v55  ;;  %v821_v60 = vmax.f32 %v785_v53, 0.0 }
 0x40f   :  { %v797_v31 = vpop.f32.mrf.mxu1 }
 0x410   :  { %v826_v36 = vmax.f32 %v806_v32, 0.0  ;;  %v798_v37 = vadd.f32 %v1055_v30, %v797_v31  ;;  %v832_v1 = vpack.c.bf16 %v821_v60, %v820_v62 }
 0x411   :  { %v1274_v33 = vpop.f32.mrf.mxu1 }
 0x412   :  { %v809_v34 = vadd.f32 %v1274_v33, %v1055_v30  ;;  %v824_v44 = vmax.f32 %v798_v37, 0.0 }
 0x413   :  { %v800_v35 = vpop.f32.mrf.mxu1 }
 0x414   :  { %v827_v38 = vmax.f32 %v809_v34, 0.0  ;;  %v801_v39 = vadd.f32 %v1055_v30, %v800_v35 }
 0x416   :  { %v835_v41 = vpack.c.bf16 %v827_v38, %v826_v36  ;;  %v825_v42 = vmax.f32 %v801_v39, 0.0 }
 0x418   :  { %1276 = vmatpush3.bf16.msra.mxu0 %v835_v41  ;;  %v834_v54 = vpack.c.bf16 %v825_v42, %v824_v44 }
 0x419   :  { %1277 = vmatprep.subr.bf16.mxu0 %v1528_v16 }
 0x41c   :  { %1278 = vmatpush3.bf16.msra.mxu0 %v834_v54 }
 0x41d   :  { %1279 = vmatprep.subr.bf16.mxu0 %v1528_v16 }
 0x420   :  { %1280 = vmatpush3.bf16.msra.mxu0 %v833_v59 }
 0x421   :  { %1281 = vmatprep.subr.bf16.mxu0 %v1528_v16 }
 0x424   :  { %1282 = vmatpush3.bf16.msra.mxu0 %v832_v1 }
 0x425   :  { %1283 = vmatprep.subr.bf16.mxu0 %v1528_v16 }
 0x428   :  { %1284 = vmatpush3.bf16.msra.mxu0 %v831_v4 }
 0x429   :  { %1285 = vmatprep.subr.bf16.mxu0 %v1528_v16 }
 0x42c   :  { %1286 = vmatpush3.bf16.msra.mxu0 %v830_v10 }
 0x42d   :  { %1287 = vmatprep.subr.bf16.mxu0 %v1528_v16 }
 0x430   :  { %1288 = vmatpush3.bf16.msra.mxu0 %v829_v13 }
 0x431   :  { %1289 = vmatprep.subr.bf16.mxu0 %v1528_v16 }
 0x434   :  { %1290 = vmatpush3.bf16.msra.mxu0 %v828_v46 }
 0x437   :  { %1292 = vmatmul.mubr.bf16.vlgmr.msra.gmra.mxu0 %v836_v47 }
 0x4f7   :  { %v871_v49 = vpop.f32.mrf.mxu0 }
 0x4f8   :  { %v894_v50 = vpack.c.bf16 %v871_v49, %v871_v49 }
 0x4f9   :  { %v1293_v51 = vpop.f32.mrf.mxu0 }
 0x4fa   :  { %1312 = vmatmul.mubr.bf16.vlgmr.msra.gmra.mxu1 %v894_v50 }
 0x4fb   :  { %v874_v52 = vpop.f32.mrf.mxu0 }
 0x4fd   :  { %v1294_v17 = vpop.f32.mrf.mxu0 }
 0x5ba   :  { %v983_v21 = vpop.f32.mrf.mxu1 }
 0x5bb   :  { %v984_v16 = vadd.f32 %v1056_v20, %v983_v21 }
 0x5bc   :  { %v1313_v22 = vpop.f32.mrf.mxu1 }
 0x5bd   :  { %v992_v23 = vsel %vm991_vm1, %v984_v16, -1e+30 }
 0x5be   :  { %993 = vmax.xlane.f32.xlu0 %v992_v23  ;;  %v986_v24 = vpop.f32.mrf.mxu1 }
 0x5c0   :  { %v1314_v25 = vpop.f32.mrf.mxu1 }
 0x647   :  { %v994_v26 = vpop.xlane.xlu0 %993 }
 0x648   :  { %v995_v27 = vsub.f32 %v992_v23, %v994_v26 }
 0x64a   :  { %v996_v28 = vmul.f32 1.442695, %v995_v27 }
 0x64c   :  { %1366 = vpow2.f32 %v996_v28 }
 0x659   :  { %v1367_v29 = vpop.eup %1366 }
 0x65a   :  { %998 = vadd.xlane.f32.xlu0 %v1367_v29 }
 0x6e3   :  { %v999_v30 = vpop.xlane.xlu0 %998 }
 0x6e4   :  { %1368 = vlog2.f32 %v999_v30 }
 0x6f1   :  { %v1369_v31 = vpop.eup %1368 }
 0x6f2   :  { %v1001_v32 = vmul.f32 0.6931472, %v1369_v31 }
 0x6f4   :  { %v1002_v33 = vsub.f32 %v995_v27, %v1001_v32 }
 0x6f6   :  { %1003 = vst [vmem:[#allocation13] sm:$0xff] %v1002_v33 }
 0x6f7   :  { %1501 = shalt.err (!%p1498_p6)
}
 0x6f8   :  { %1013 = dma.vmem_to_hbm [thread:$0]  %s1011_s19, 128, %s1685_s9, [#allocation4]  }
 0x6f9   :  { %1518 = dma.done.wait [#allocation4], 128  }
 0x6fa   :  { %1519 = vsyncadd [#allocation4], 4294967168 }
 0x6fb   :  { %1017 = vsyncpa [#allocation3], 1 }
 0x6fc   :  { %1018 = vsyncpa [#allocation6], 1 }
 0x6fd   :  { %1019 = vsyncpa [#allocation9], 1 }
 0x6fe   :  { %1020 = vsyncpa [#allocation12], 1 }
 0x6ff   :  { %1021 = vsyncpa [#allocation4], 1 }

</bundles_post_ra>
